<compile_context>
chip_gen: v5e
topology: v5e:2x2
jax: 0.10.0
libtpu: 0.0.40
codegen_flags: <defaults>
</compile_context>

<pallas_src>
import functools

import jax
import jax.numpy as jnp
from jax.experimental import pallas as pl
from jax.experimental.pallas import tpu as pltpu

LANE = 128   # padded hidden / output lane width (one vreg lane group)
SUB = 8      # sublane group: padded batch and padded input-feature dim


def _slab_rows(dp: int, hp: int):
    """Static row offsets of each parameter inside the packed weight slab."""
    r_wih = 0                     # rows [0, dp)              : W_ih^T  (D x H)
    r_whh = dp                    # rows [dp, dp+hp)          : W_hh^T  (H x H)
    r_b = dp + hp                 # row  dp+hp                : b_ih + b_hh
    r_wfc = dp + hp + SUB         # rows [r_wfc, r_wfc+hp)    : W_fc^T  (H x O)
    r_bfc = dp + 2 * hp + SUB     # row  r_bfc                : b_fc
    total = dp + 2 * hp + 2 * SUB
    return r_wih, r_whh, r_b, r_wfc, r_bfc, total


def rnn_fused_kernel(x_ref, w_ref, out_ref):
    """Whole forward pass in a single kernel invocation (no grid).

    x_ref   : (L*8, 8)   time-major, batch- and feature-padded input
               (rows [t*8:(t+1)*8] = timestep t, real batch rows 0..B-1)
    w_ref   : (8+2*128+16, 128) packed fp32 weight slab (see _slab_rows / prepare_params)
    out_ref : (8, 128)   lane-dense output tile; real (B, O) block is sliced outside
    """
    bp = out_ref.shape[0]          # padded batch (8)
    dp = x_ref.shape[1]            # padded input dim (8)
    hp = w_ref.shape[1]            # padded hidden/lane dim (128)
    L = x_ref.shape[0] // bp

    r_wih, r_whh, r_b, r_wfc, r_bfc, _ = _slab_rows(dp, hp)
    # Static, sublane-aligned slices of the resident weight slab (plain VMEM loads).
    wih = w_ref[r_wih:r_wih + dp, :]       # (dp, hp)   W_ih^T  (zero-padded)
    whh = w_ref[r_whh:r_whh + hp, :]       # (hp, hp)   W_hh^T  (zero-padded)
    b = w_ref[r_b:r_b + 1, :]              # (1, hp)    b_ih + b_hh
    wfc = w_ref[r_wfc:r_wfc + hp, :]       # (hp, hp)   W_fc^T  (zero-padded)
    bfc = w_ref[r_bfc:r_bfc + 1, :]        # (1, hp)    b_fc

    # (1) Hoisted input projection for ALL timesteps + fused bias (off the serial chain).
    xw = jnp.dot(x_ref[...], wih, preferred_element_type=jnp.float32) + b   # (L*bp, hp)

    # (2) Serial recurrence, fully unrolled (static trip count L). Every per-step slice
    #     of xw starts at a multiple of 8 rows -> whole padded sublane groups, no
    #     unaligned selects on the critical path.
    h = jnp.zeros((bp, hp), jnp.float32)
    for t in range(L):
        h = jnp.tanh(
            xw[t * bp:(t + 1) * bp, :]
            + jnp.dot(h, whh, preferred_element_type=jnp.float32)
        )

    # (3) Fused dense head; full (8,128) lane-dense store (pad lanes are exactly 0).
    out_ref[...] = (
        jnp.dot(h, wfc, preferred_element_type=jnp.float32) + bfc
    ).astype(out_ref.dtype)


def prepare_params(w_ih, w_hh, b_ih, b_hh, w_fc, b_fc, dp=SUB, hp=LANE):
    """One-time (setup-time) packing of all parameters into a single lane-dense fp32
    slab: transposes, bias fusion and zero-padding happen here, NOT per forward call.
    PyTorch conventions: w_ih (H, D), w_hh (H, H), b_ih/b_hh (H,), w_fc (O, H), b_fc (O,)."""
    H, D = w_ih.shape
    O = w_fc.shape[0]
    assert D <= dp and H <= hp and O <= hp
    r_wih, r_whh, r_b, r_wfc, r_bfc, total = _slab_rows(dp, hp)
    slab = jnp.zeros((total, hp), jnp.float32)
    slab = slab.at[r_wih:r_wih + D, :H].set(jnp.transpose(w_ih).astype(jnp.float32))
    slab = slab.at[r_whh:r_whh + H, :H].set(jnp.transpose(w_hh).astype(jnp.float32))
    slab = slab.at[r_b, :H].set((b_ih + b_hh).astype(jnp.float32))
    slab = slab.at[r_wfc:r_wfc + H, :O].set(jnp.transpose(w_fc).astype(jnp.float32))
    slab = slab.at[r_bfc, :O].set(b_fc.astype(jnp.float32))
    return slab


@functools.partial(jax.jit, static_argnames=("output_dim",))
def rnn_forward(x, slab, output_dim):
    """x: (B, L, D) float32, batch_first. slab: packed params from prepare_params()."""
    B, L, D = x.shape
    assert D <= SUB and B <= SUB
    hp = slab.shape[1]

    # Per-call input shaping only (fused under jit): time-major + pad B->8, D->8.
    x_tm = jnp.transpose(x, (1, 0, 2))                                   # (L, B, D)
    x_pad = jnp.zeros((L, SUB, SUB), jnp.float32).at[:, :B, :D].set(x_tm)
    x2d = x_pad.reshape(L * SUB, SUB)                                    # (L*8, 8)

    vmem = lambda: pl.BlockSpec(memory_space=pltpu.MemorySpace.VMEM)
    out_pad = pl.pallas_call(
        rnn_fused_kernel,
        out_shape=jax.ShapeDtypeStruct((SUB, hp), jnp.float32),
        in_specs=[vmem(), vmem()],       # whole arrays resident in VMEM, 2 input DMAs
        out_specs=vmem(),
    )(x2d, slab)
    return out_pad[:B, :output_dim]


def rnn_reference(x, w_ih, w_hh, b_ih, b_hh, w_fc, b_fc):
    """Pure-JAX reference of the same forward pass."""
    B, L, D = x.shape
    H = w_ih.shape[0]

    def step(h, x_t):
        h_new = jnp.tanh(x_t @ w_ih.T + b_ih + h @ w_hh.T + b_hh)
        return h_new, None

    h0 = jnp.zeros((B, H), jnp.float32)
    h_last, _ = jax.lax.scan(step, h0, jnp.transpose(x, (1, 0, 2)))
    return h_last @ w_fc.T + b_fc


if __name__ == "__main__":
    # Module config: input_len=8, input_dims=4 (alphabet), hidden_dim=32,
    # num_layers=1, unidirectional vanilla RNN, output_dim=8, default dense_kwargs.
    B, L, D, H, O = 2, 8, 4, 32, 8

    key = jax.random.PRNGKey(0)
    kx, k1, k2, k3, k4, k5, k6 = jax.random.split(key, 7)

    x = jax.random.normal(kx, (B, L, D), jnp.float32)          # (batch, seq, alphabet)
    scale = 1.0 / jnp.sqrt(jnp.float32(H))
    w_ih = jax.random.uniform(k1, (H, D), jnp.float32, -scale, scale)
    w_hh = jax.random.uniform(k2, (H, H), jnp.float32, -scale, scale)
    b_ih = jax.random.uniform(k3, (H,), jnp.float32, -scale, scale)
    b_hh = jax.random.uniform(k4, (H,), jnp.float32, -scale, scale)
    w_fc = jax.random.uniform(k5, (O, H), jnp.float32, -scale, scale)
    b_fc = jax.random.uniform(k6, (O,), jnp.float32, -scale, scale)

    # One-time parameter packing (model setup, off the per-call hot path).
    slab = jax.block_until_ready(prepare_params(w_ih, w_hh, b_ih, b_hh, w_fc, b_fc))

    out = rnn_forward(x, slab, O)
    out = jax.block_until_ready(out)

    ref = rnn_reference(x, w_ih, w_hh, b_ih, b_hh, w_fc, b_fc)
    assert out.shape == (B, O)
    assert jnp.allclose(out, ref, atol=1e-5, rtol=1e-5), (out, ref)

    print("KERNEL_OK")
</pallas_src>

<mosaic_0001>
module attributes {stable_mosaic.version = 11 : i64} {
  func.func @rnn_fused_kernel(%arg0: memref<64x8xf32, #tpu.memory_space<vmem>>, %arg1: memref<280x128xf32, #tpu.memory_space<vmem>>, %arg2: memref<8x128xf32, #tpu.memory_space<vmem>>) attributes {dimension_semantics = [], scalar_prefetch = 0 : i64, scratch_operands = 0 : i64, tpu.core_type = #tpu.core_type<tc>} {
    %c0 = arith.constant 0 : index
    %c0_0 = arith.constant 0 : index
    %0 = vector.load %arg1[%c0, %c0_0] : memref<280x128xf32, #tpu.memory_space<vmem>>, vector<8x128xf32>
    %c8 = arith.constant 8 : index
    %c0_1 = arith.constant 0 : index
    %1 = vector.load %arg1[%c8, %c0_1] : memref<280x128xf32, #tpu.memory_space<vmem>>, vector<128x128xf32>
    %c136 = arith.constant 136 : index
    %c0_2 = arith.constant 0 : index
    %2 = vector.load %arg1[%c136, %c0_2] : memref<280x128xf32, #tpu.memory_space<vmem>>, vector<1x128xf32>
    %c144 = arith.constant 144 : index
    %c0_3 = arith.constant 0 : index
    %3 = vector.load %arg1[%c144, %c0_3] : memref<280x128xf32, #tpu.memory_space<vmem>>, vector<128x128xf32>
    %c272 = arith.constant 272 : index
    %c0_4 = arith.constant 0 : index
    %4 = vector.load %arg1[%c272, %c0_4] : memref<280x128xf32, #tpu.memory_space<vmem>>, vector<1x128xf32>
    %c0_5 = arith.constant 0 : index
    %c0_6 = arith.constant 0 : index
    %5 = vector.load %arg0[%c0_5, %c0_6] : memref<64x8xf32, #tpu.memory_space<vmem>>, vector<64x8xf32>
    %cst = arith.constant dense<0.000000e+00> : vector<64x128xf32>
    %6 = tpu.matmul %5, %0, %cst {dimension_numbers = #tpu.dot_dimension_numbers<[1], [0], [0], [1], [0, 0, 1, 1], [], []>} : vector<64x8xf32>, vector<8x128xf32>, vector<64x128xf32> -> vector<64x128xf32>
    %7 = vector.broadcast %2 : vector<1x128xf32> to vector<64x128xf32>
    %8 = arith.addf %6, %7 : vector<64x128xf32>
    %cst_7 = arith.constant 0.000000e+00 : f32
    %9 = vector.broadcast %cst_7 : f32 to vector<8x128xf32>
    %10 = vector.extract_strided_slice %8 {offsets = [0, 0], sizes = [8, 128], strides = [1, 1]} : vector<64x128xf32> to vector<8x128xf32>
    %cst_8 = arith.constant dense<0.000000e+00> : vector<8x128xf32>
    %11 = tpu.matmul %9, %1, %cst_8 {dimension_numbers = #tpu.dot_dimension_numbers<[1], [0], [0], [1], [0, 0, 1, 1], [], []>} : vector<8x128xf32>, vector<128x128xf32>, vector<8x128xf32> -> vector<8x128xf32>
    %12 = arith.addf %10, %11 : vector<8x128xf32>
    %13 = math.tanh %12 : vector<8x128xf32>
    %14 = vector.extract_strided_slice %8 {offsets = [8, 0], sizes = [8, 128], strides = [1, 1]} : vector<64x128xf32> to vector<8x128xf32>
    %cst_9 = arith.constant dense<0.000000e+00> : vector<8x128xf32>
    %15 = tpu.matmul %13, %1, %cst_9 {dimension_numbers = #tpu.dot_dimension_numbers<[1], [0], [0], [1], [0, 0, 1, 1], [], []>} : vector<8x128xf32>, vector<128x128xf32>, vector<8x128xf32> -> vector<8x128xf32>
    %16 = arith.addf %14, %15 : vector<8x128xf32>
    %17 = math.tanh %16 : vector<8x128xf32>
    %18 = vector.extract_strided_slice %8 {offsets = [16, 0], sizes = [8, 128], strides = [1, 1]} : vector<64x128xf32> to vector<8x128xf32>
    %cst_10 = arith.constant dense<0.000000e+00> : vector<8x128xf32>
    %19 = tpu.matmul %17, %1, %cst_10 {dimension_numbers = #tpu.dot_dimension_numbers<[1], [0], [0], [1], [0, 0, 1, 1], [], []>} : vector<8x128xf32>, vector<128x128xf32>, vector<8x128xf32> -> vector<8x128xf32>
    %20 = arith.addf %18, %19 : vector<8x128xf32>
    %21 = math.tanh %20 : vector<8x128xf32>
    %22 = vector.extract_strided_slice %8 {offsets = [24, 0], sizes = [8, 128], strides = [1, 1]} : vector<64x128xf32> to vector<8x128xf32>
    %cst_11 = arith.constant dense<0.000000e+00> : vector<8x128xf32>
    %23 = tpu.matmul %21, %1, %cst_11 {dimension_numbers = #tpu.dot_dimension_numbers<[1], [0], [0], [1], [0, 0, 1, 1], [], []>} : vector<8x128xf32>, vector<128x128xf32>, vector<8x128xf32> -> vector<8x128xf32>
    %24 = arith.addf %22, %23 : vector<8x128xf32>
    %25 = math.tanh %24 : vector<8x128xf32>
    %26 = vector.extract_strided_slice %8 {offsets = [32, 0], sizes = [8, 128], strides = [1, 1]} : vector<64x128xf32> to vector<8x128xf32>
    %cst_12 = arith.constant dense<0.000000e+00> : vector<8x128xf32>
    %27 = tpu.matmul %25, %1, %cst_12 {dimension_numbers = #tpu.dot_dimension_numbers<[1], [0], [0], [1], [0, 0, 1, 1], [], []>} : vector<8x128xf32>, vector<128x128xf32>, vector<8x128xf32> -> vector<8x128xf32>
    %28 = arith.addf %26, %27 : vector<8x128xf32>
    %29 = math.tanh %28 : vector<8x128xf32>
    %30 = vector.extract_strided_slice %8 {offsets = [40, 0], sizes = [8, 128], strides = [1, 1]} : vector<64x128xf32> to vector<8x128xf32>
    %cst_13 = arith.constant dense<0.000000e+00> : vector<8x128xf32>
    %31 = tpu.matmul %29, %1, %cst_13 {dimension_numbers = #tpu.dot_dimension_numbers<[1], [0], [0], [1], [0, 0, 1, 1], [], []>} : vector<8x128xf32>, vector<128x128xf32>, vector<8x128xf32> -> vector<8x128xf32>
    %32 = arith.addf %30, %31 : vector<8x128xf32>
    %33 = math.tanh %32 : vector<8x128xf32>
    %34 = vector.extract_strided_slice %8 {offsets = [48, 0], sizes = [8, 128], strides = [1, 1]} : vector<64x128xf32> to vector<8x128xf32>
    %cst_14 = arith.constant dense<0.000000e+00> : vector<8x128xf32>
    %35 = tpu.matmul %33, %1, %cst_14 {dimension_numbers = #tpu.dot_dimension_numbers<[1], [0], [0], [1], [0, 0, 1, 1], [], []>} : vector<8x128xf32>, vector<128x128xf32>, vector<8x128xf32> -> vector<8x128xf32>
    %36 = arith.addf %34, %35 : vector<8x128xf32>
    %37 = math.tanh %36 : vector<8x128xf32>
    %38 = vector.extract_strided_slice %8 {offsets = [56, 0], sizes = [8, 128], strides = [1, 1]} : vector<64x128xf32> to vector<8x128xf32>
    %cst_15 = arith.constant dense<0.000000e+00> : vector<8x128xf32>
    %39 = tpu.matmul %37, %1, %cst_15 {dimension_numbers = #tpu.dot_dimension_numbers<[1], [0], [0], [1], [0, 0, 1, 1], [], []>} : vector<8x128xf32>, vector<128x128xf32>, vector<8x128xf32> -> vector<8x128xf32>
    %40 = arith.addf %38, %39 : vector<8x128xf32>
    %41 = math.tanh %40 : vector<8x128xf32>
    %cst_16 = arith.constant dense<0.000000e+00> : vector<8x128xf32>
    %42 = tpu.matmul %41, %3, %cst_16 {dimension_numbers = #tpu.dot_dimension_numbers<[1], [0], [0], [1], [0, 0, 1, 1], [], []>} : vector<8x128xf32>, vector<128x128xf32>, vector<8x128xf32> -> vector<8x128xf32>
    %43 = vector.broadcast %4 : vector<1x128xf32> to vector<8x128xf32>
    %44 = arith.addf %42, %43 : vector<8x128xf32>
    %c0_17 = arith.constant 0 : index
    %c0_18 = arith.constant 0 : index
    %45 = vector.load %arg2[%c0_17, %c0_18] : memref<8x128xf32, #tpu.memory_space<vmem>>, vector<8x128xf32>
    tpu.vector_store %arg2[%c0_17, %c0_18], %44 {strides = array<i32>} : memref<8x128xf32, #tpu.memory_space<vmem>>, vector<8x128xf32>,
    return
  }
}

</mosaic_0001>

<bundles_post_ra>
// kernel: rnn_forward.1
= control target key start
LH: loop header
LB: loop body
LE: loop exit
PB: predicated region body
PF: predicated region fallthrough
CT: control target
= control target key end

     0   :  { %7 = vsyncpa [#allocation3], 0  ;;  %s396_s12 = smov [#allocation2]   ;;  %s397_s14 = smov 128   ;;  %s623_s0 = inlined_call_operand.vmem [shape: f32[64,8], index: 0, kind: input, shape index: {}]   ;;  %s624_s1 = inlined_call_operand.hbm [shape: f32[280,128], index: 1, kind: input, shape index: {}]   ;;  %s625_s2 = inlined_call_operand.vmem [shape: f32[8,128], index: 2, kind: output, shape index: {}]  }
   0x1   :  { %s14_s11 = sshll.u32 %s624_s1, 4  ;;  %s16_s13 = sshll.u32 %s396_s12, 4  ;;  %s15_s11 = int_to_ptr.hbm [resolvable:$true] %s14_s11  ;;  %s17_s13 = int_to_ptr.vmem [resolvable:$true] %s16_s13 }
   0x2   :  { %s398_s15 = smov 8  }
   0x3   :  { %22 = dma.hbm_to_vmem [thread:$0]  %s15_s11, 4480, %s17_s13, [#allocation3], %s397_s14, %s397_s14, %s398_s15  }
   0x4   :  { %394 = dma.done.wait [#allocation3], 4480  }
   0x5   :  { %395 = vsyncadd [#allocation3], 4294962816  ;;  %v418_v0 = vld [vmem:[#allocation2 + $0x80] sm:$0xff]  ;;  %v420_v1 = vld [vmem:[#allocation2 + $0x78] sm:$0xff]  ;;  %vm71_vm0 = vcmask 64512   ;;  %v399_v18 = vmov 0.0  }
   0x6   :  { %137 = vmatpush.msra.mxu1 %v418_v0  ;;  %159 = vmatpush.msra.mxu2 %v418_v0  ;;  %v424_v2 = vld [vmem:[#allocation2 + $0x70] sm:$0xff]  ;;  %v429_v3 = vld [vmem:[#allocation2 + $0x68] sm:$0xff]  ;;  %v27_v4 = vld [vmem:[#allocation2] sm:$0xff] }
   0x7   :  { %181 = vmatpush.msra.mxu3 %v418_v0  ;;  %111 = vmatpush.msra.mxu0 %v27_v4  ;;  %v62_v5 = vld [vmem:[%s623_s0] sm:$0xff]  ;;  %v442_v7 = vld [vmem:[#allocation2 + $0x58] sm:$0xff]  ;;  %v448_v8 = vld [vmem:[#allocation2 + $0x50] sm:$0xff] }
   0x8   :  { %138 = vmatpush.msra.mxu1 %v420_v1  ;;  %160 = vmatpush.msra.mxu2 %v420_v1  ;;  %v436_v6 = vld [vmem:[#allocation2 + $0x60] sm:$0xff]  ;;  %v454_v9 = vld [vmem:[#allocation2 + $0x48] sm:$0xff]  ;;  %v466_v11 = vld [vmem:[#allocation2 + $0x38] sm:$0xff] }
   0x9   :  { %182 = vmatpush.msra.mxu3 %v420_v1  ;;  %340 = vmatmul.msk.f32.vlgmr.msra.gmra.mxu0 %vm71_vm0, %v62_v5  ;;  %v460_v10 = vld [vmem:[#allocation2 + $0x40] sm:$0xff]  ;;  %v472_v12 = vld [vmem:[#allocation2 + $0x30] sm:$0xff]  ;;  %v478_v13 = vld [vmem:[#allocation2 + $0x28] sm:$0xff] }
   0xa   :  { %139 = vmatpush.msra.mxu1 %v424_v2  ;;  %161 = vmatpush.msra.mxu2 %v424_v2  ;;  %v484_v14 = vld [vmem:[#allocation2 + $0x20] sm:$0xff]  ;;  %v490_v15 = vld [vmem:[#allocation2 + $0x18] sm:$0xff]  ;;  %v496_v16 = vld [vmem:[#allocation2 + $0x10] sm:$0xff] }
   0xb   :  { %183 = vmatpush.msra.mxu3 %v424_v2  ;;  %269 = vmatpush.msrb.mxu0 %v418_v0  ;;  %v502_v17 = vld [vmem:[#allocation2 + $0x8] sm:$0xff]  ;;  %v64_v26 = vld [vmem:[%s623_s0 + $0x10] sm:$0xff]  ;;  %v65_v32 = vld [vmem:[%s623_s0 + $0x18] sm:$0xff] }
   0xc   :  { %140 = vmatpush.msra.mxu1 %v429_v3  ;;  %162 = vmatpush.msra.mxu2 %v429_v3  ;;  %v63_v19 = vld [vmem:[%s623_s0 + $0x8] sm:$0xff]  ;;  %v66_v38 = vld [vmem:[%s623_s0 + $0x20] sm:$0xff]  ;;  %v68_v45 = vld [vmem:[%s623_s0 + $0x30] sm:$0xff] }
   0xd   :  { %184 = vmatpush.msra.mxu3 %v429_v3  ;;  %270 = vmatpush.msrb.mxu0 %v420_v1  ;;  %v586_v20 = vld [vmem:[#allocation2 + $0x88] ss:$0 sm:$0xff]  ;;  %v69_v51 = vld [vmem:[%s623_s0 + $0x38] sm:$0xff]  ;;  %v59_v58 = vld [vmem:[#allocation2 + $0x100] sm:$0xff] }
   0xe   :  { %141 = vmatpush.msra.mxu1 %v436_v6  ;;  %163 = vmatpush.msra.mxu2 %v436_v6  ;;  %v67_v44 = vld [vmem:[%s623_s0 + $0x28] sm:$0xff]  ;;  %v58_v60 = vld [vmem:[#allocation2 + $0xf8] sm:$0xff]  ;;  %v57_v61 = vld [vmem:[#allocation2 + $0xf0] sm:$0xff] }
   0xf   :  { %185 = vmatpush.msra.mxu3 %v436_v6  ;;  %271 = vmatpush.msrb.mxu0 %v424_v2  ;;  %v60_v57 = vld [vmem:[#allocation2 + $0x108] sm:$0xff]  ;;  %v55_v63 = vld [vmem:[#allocation2 + $0xe0] sm:$0xff]  ;;  %v50_v5 = vld [vmem:[#allocation2 + $0xb8] sm:$0xff] }
  0x10   :  { %142 = vmatpush.msra.mxu1 %v442_v7  ;;  %164 = vmatpush.msra.mxu2 %v442_v7  ;;  %v56_v62 = vld [vmem:[#allocation2 + $0xe8] sm:$0xff]  ;;  %v51_v4 = vld [vmem:[#allocation2 + $0xc0] sm:$0xff] }
  0x11   :  { %186 = vmatpush.msra.mxu3 %v442_v7  ;;  %272 = vmatpush.msrb.mxu0 %v429_v3 }
  0x12   :  { %143 = vmatpush.msra.mxu1 %v448_v8  ;;  %165 = vmatpush.msra.mxu2 %v448_v8 }
  0x13   :  { %187 = vmatpush.msra.mxu3 %v448_v8  ;;  %273 = vmatpush.msrb.mxu0 %v436_v6 }
  0x14   :  { %144 = vmatpush.msra.mxu1 %v454_v9  ;;  %166 = vmatpush.msra.mxu2 %v454_v9 }
  0x15   :  { %188 = vmatpush.msra.mxu3 %v454_v9  ;;  %274 = vmatpush.msrb.mxu0 %v442_v7 }
  0x16   :  { %145 = vmatpush.msra.mxu1 %v460_v10  ;;  %167 = vmatpush.msra.mxu2 %v460_v10 }
  0x17   :  { %189 = vmatpush.msra.mxu3 %v460_v10  ;;  %275 = vmatpush.msrb.mxu0 %v448_v8 }
  0x18   :  { %146 = vmatpush.msra.mxu1 %v466_v11  ;;  %168 = vmatpush.msra.mxu2 %v466_v11 }
  0x19   :  { %190 = vmatpush.msra.mxu3 %v466_v11  ;;  %276 = vmatpush.msrb.mxu0 %v454_v9 }
  0x1a   :  { %147 = vmatpush.msra.mxu1 %v472_v12  ;;  %169 = vmatpush.msra.mxu2 %v472_v12 }
  0x1b   :  { %191 = vmatpush.msra.mxu3 %v472_v12  ;;  %277 = vmatpush.msrb.mxu0 %v460_v10 }
  0x1c   :  { %148 = vmatpush.msra.mxu1 %v478_v13  ;;  %170 = vmatpush.msra.mxu2 %v478_v13 }
  0x1d   :  { %192 = vmatpush.msra.mxu3 %v478_v13  ;;  %278 = vmatpush.msrb.mxu0 %v466_v11 }
  0x1e   :  { %149 = vmatpush.msra.mxu1 %v484_v14  ;;  %171 = vmatpush.msra.mxu2 %v484_v14 }
  0x1f   :  { %193 = vmatpush.msra.mxu3 %v484_v14  ;;  %279 = vmatpush.msrb.mxu0 %v472_v12 }
  0x20   :  { %150 = vmatpush.msra.mxu1 %v490_v15  ;;  %172 = vmatpush.msra.mxu2 %v490_v15 }
  0x21   :  { %194 = vmatpush.msra.mxu3 %v490_v15  ;;  %280 = vmatpush.msrb.mxu0 %v478_v13 }
  0x22   :  { %151 = vmatpush.msra.mxu1 %v496_v16  ;;  %173 = vmatpush.msra.mxu2 %v496_v16 }
  0x23   :  { %195 = vmatpush.msra.mxu3 %v496_v16  ;;  %281 = vmatpush.msrb.mxu0 %v484_v14 }
  0x24   :  { %152 = vmatpush.msra.mxu1 %v502_v17  ;;  %174 = vmatpush.msra.mxu2 %v502_v17 }
  0x25   :  { %153 = vmatmul.f32.vlgmr.msra.gmra.mxu1 %v399_v18  ;;  %196 = vmatpush.msra.mxu3 %v502_v17 }
  0x26   :  { %203 = vmatpush.msrb.mxu1 %v418_v0  ;;  %225 = vmatpush.msrb.mxu2 %v418_v0 }
  0x27   :  { %247 = vmatpush.msrb.mxu3 %v418_v0  ;;  %282 = vmatpush.msrb.mxu0 %v490_v15 }
  0x28   :  { %204 = vmatpush.msrb.mxu1 %v420_v1  ;;  %226 = vmatpush.msrb.mxu2 %v420_v1 }
  0x29   :  { %248 = vmatpush.msrb.mxu3 %v420_v1  ;;  %283 = vmatpush.msrb.mxu0 %v496_v16 }
  0x2a   :  { %205 = vmatpush.msrb.mxu1 %v424_v2  ;;  %227 = vmatpush.msrb.mxu2 %v424_v2 }
  0x2b   :  { %249 = vmatpush.msrb.mxu3 %v424_v2  ;;  %284 = vmatpush.msrb.mxu0 %v502_v17 }
  0x2c   :  { %206 = vmatpush.msrb.mxu1 %v429_v3  ;;  %228 = vmatpush.msrb.mxu2 %v429_v3 }
  0x2d   :  { %250 = vmatpush.msrb.mxu3 %v429_v3  ;;  %341 = vmatmul.msk.f32.gmra.mxu0 %vm71_vm0, %v63_v19  ;;  %v353_v19 = vld [vmem:[#allocation2 + $0x110] ss:$0 sm:$0xff] }
  0x2e   :  { %207 = vmatpush.msrb.mxu1 %v436_v6  ;;  %229 = vmatpush.msrb.mxu2 %v436_v6 }
  0x2f   :  { %251 = vmatpush.msrb.mxu3 %v436_v6 }
  0x30   :  { %208 = vmatpush.msrb.mxu1 %v442_v7  ;;  %230 = vmatpush.msrb.mxu2 %v442_v7 }
  0x31   :  { %252 = vmatpush.msrb.mxu3 %v442_v7 }
  0x32   :  { %209 = vmatpush.msrb.mxu1 %v448_v8  ;;  %231 = vmatpush.msrb.mxu2 %v448_v8 }
  0x33   :  { %253 = vmatpush.msrb.mxu3 %v448_v8 }
  0x34   :  { %210 = vmatpush.msrb.mxu1 %v454_v9  ;;  %232 = vmatpush.msrb.mxu2 %v454_v9 }
  0x35   :  { %254 = vmatpush.msrb.mxu3 %v454_v9  ;;  %342 = vmatmul.msk.f32.gmra.mxu0 %vm71_vm0, %v64_v26 }
  0x36   :  { %211 = vmatpush.msrb.mxu1 %v460_v10  ;;  %233 = vmatpush.msrb.mxu2 %v460_v10 }
  0x37   :  { %255 = vmatpush.msrb.mxu3 %v460_v10 }
  0x38   :  { %212 = vmatpush.msrb.mxu1 %v466_v11  ;;  %234 = vmatpush.msrb.mxu2 %v466_v11 }
  0x39   :  { %256 = vmatpush.msrb.mxu3 %v466_v11 }
  0x3a   :  { %213 = vmatpush.msrb.mxu1 %v472_v12  ;;  %235 = vmatpush.msrb.mxu2 %v472_v12 }
  0x3b   :  { %257 = vmatpush.msrb.mxu3 %v472_v12 }
  0x3c   :  { %214 = vmatpush.msrb.mxu1 %v478_v13  ;;  %236 = vmatpush.msrb.mxu2 %v478_v13 }
  0x3d   :  { %258 = vmatpush.msrb.mxu3 %v478_v13  ;;  %343 = vmatmul.msk.f32.gmra.mxu0 %vm71_vm0, %v65_v32 }
  0x3e   :  { %215 = vmatpush.msrb.mxu1 %v484_v14  ;;  %237 = vmatpush.msrb.mxu2 %v484_v14 }
  0x3f   :  { %259 = vmatpush.msrb.mxu3 %v484_v14 }
  0x40   :  { %216 = vmatpush.msrb.mxu1 %v490_v15  ;;  %238 = vmatpush.msrb.mxu2 %v490_v15 }
  0x41   :  { %260 = vmatpush.msrb.mxu3 %v490_v15 }
  0x42   :  { %217 = vmatpush.msrb.mxu1 %v496_v16  ;;  %239 = vmatpush.msrb.mxu2 %v496_v16 }
  0x43   :  { %261 = vmatpush.msrb.mxu3 %v496_v16 }
  0x44   :  { %218 = vmatpush.msrb.mxu1 %v502_v17  ;;  %240 = vmatpush.msrb.mxu2 %v502_v17 }
  0x45   :  { %262 = vmatpush.msrb.mxu3 %v502_v17  ;;  %344 = vmatmul.msk.f32.gmra.mxu0 %vm71_vm0, %v66_v38 }
  0x46   :  { %291 = vmatpush.msra.mxu1 %v418_v0  ;;  %v54_v0 = vld [vmem:[#allocation2 + $0xd8] sm:$0xff] }
  0x48   :  { %292 = vmatpush.msra.mxu1 %v420_v1 }
  0x4a   :  { %293 = vmatpush.msra.mxu1 %v424_v2  ;;  %v53_v2 = vld [vmem:[#allocation2 + $0xd0] sm:$0xff] }
  0x4c   :  { %294 = vmatpush.msra.mxu1 %v429_v3  ;;  %v52_v3 = vld [vmem:[#allocation2 + $0xc8] sm:$0xff] }
  0x4d   :  { %345 = vmatmul.msk.f32.gmra.mxu0 %vm71_vm0, %v67_v44 }
  0x4e   :  { %295 = vmatpush.msra.mxu1 %v436_v6 }
  0x50   :  { %296 = vmatpush.msra.mxu1 %v442_v7 }
  0x52   :  { %297 = vmatpush.msra.mxu1 %v448_v8 }
  0x54   :  { %298 = vmatpush.msra.mxu1 %v454_v9 }
  0x55   :  { %346 = vmatmul.msk.f32.gmra.mxu0 %vm71_vm0, %v68_v45 }
  0x56   :  { %299 = vmatpush.msra.mxu1 %v460_v10  ;;  %v49_v10 = vld [vmem:[#allocation2 + $0xb0] sm:$0xff] }
  0x58   :  { %300 = vmatpush.msra.mxu1 %v466_v11  ;;  %v48_v11 = vld [vmem:[#allocation2 + $0xa8] sm:$0xff] }
  0x5a   :  { %301 = vmatpush.msra.mxu1 %v472_v12  ;;  %v47_v12 = vld [vmem:[#allocation2 + $0xa0] sm:$0xff] }
  0x5c   :  { %302 = vmatpush.msra.mxu1 %v478_v13  ;;  %v46_v13 = vld [vmem:[#allocation2 + $0x98] sm:$0xff] }
  0x5d   :  { %347 = vmatmul.msk.f32.gmra.mxu0 %vm71_vm0, %v69_v51 }
  0x5e   :  { %303 = vmatpush.msra.mxu1 %v484_v14  ;;  %v45_v14 = vld [vmem:[#allocation2 + $0x90] sm:$0xff] }
  0x60   :  { %304 = vmatpush.msra.mxu1 %v490_v15 }
  0x62   :  { %305 = vmatpush.msra.mxu1 %v496_v16 }
  0x64   :  { %306 = vmatpush.msra.mxu1 %v502_v17 }
  0x86   :  { %v113_v21 = vpop.f32.mrf.mxu0 }
  0x87   :  { %v114_v22 = vadd.f32 %v586_v20, %v113_v21 }
  0xa2   :  { %v154_v23 = vpop.f32.mrf.mxu1 }
  0xa3   :  { %v157_v24 = vadd.f32 %v154_v23, %v114_v22 }
  0xa5   :  { %354 = vtanh.f32 %v157_v24 }
  0xaa   :  { %v116_v27 = vpop.f32.mrf.mxu0 }
  0xab   :  { %v355_v25 = vpop.eup %354  ;;  %v117_v28 = vadd.f32 %v586_v20, %v116_v27 }
  0xac   :  { %175 = vmatmul.f32.vlgmr.msra.gmra.mxu2 %v355_v25 }
  0xad   :  { %314 = vmatpush.msra.mxu2 %v60_v57 }
  0xaf   :  { %315 = vmatpush.msra.mxu2 %v59_v58 }
  0xb1   :  { %316 = vmatpush.msra.mxu2 %v58_v60 }
  0xb2   :  { %v119_v33 = vpop.f32.mrf.mxu0 }
  0xb3   :  { %v120_v34 = vadd.f32 %v586_v20, %v119_v33  ;;  %317 = vmatpush.msra.mxu2 %v57_v61 }
  0xb5   :  { %318 = vmatpush.msra.mxu2 %v56_v62 }
  0xb7   :  { %319 = vmatpush.msra.mxu2 %v55_v63 }
  0xb9   :  { %320 = vmatpush.msra.mxu2 %v54_v0 }
  0xba   :  { %v122_v39 = vpop.f32.mrf.mxu0 }
  0xbb   :  { %v123_v40 = vadd.f32 %v586_v20, %v122_v39  ;;  %321 = vmatpush.msra.mxu2 %v53_v2 }
  0xbd   :  { %322 = vmatpush.msra.mxu2 %v52_v3 }
  0xbf   :  { %323 = vmatpush.msra.mxu2 %v51_v4 }
  0xc1   :  { %324 = vmatpush.msra.mxu2 %v50_v5 }
  0xc2   :  { %v125_v46 = vpop.f32.mrf.mxu0 }
  0xc3   :  { %v126_v47 = vadd.f32 %v586_v20, %v125_v46  ;;  %325 = vmatpush.msra.mxu2 %v49_v10 }
  0xc5   :  { %326 = vmatpush.msra.mxu2 %v48_v11 }
  0xc7   :  { %327 = vmatpush.msra.mxu2 %v47_v12 }
  0xc9   :  { %328 = vmatpush.msra.mxu2 %v46_v13 }
  0xca   :  { %v128_v52 = vpop.f32.mrf.mxu0 }
  0xcb   :  { %v129_v53 = vadd.f32 %v586_v20, %v128_v52  ;;  %329 = vmatpush.msra.mxu2 %v45_v14 }
  0xd2   :  { %v131_v59 = vpop.f32.mrf.mxu0 }
  0xd3   :  { %v132_v6 = vadd.f32 %v586_v20, %v131_v59 }
  0xda   :  { %v134_v1 = vpop.f32.mrf.mxu0 }
  0xdb   :  { %v135_v15 = vadd.f32 %v586_v20, %v134_v1 }
 0x12f   :  { %v176_v29 = vpop.f32.mrf.mxu2 }
 0x130   :  { %v179_v30 = vadd.f32 %v176_v29, %v117_v28 }
 0x132   :  { %356 = vtanh.f32 %v179_v30 }
 0x138   :  { %v357_v31 = vpop.eup %356 }
 0x139   :  { %197 = vmatmul.f32.vlgmr.msra.gmra.mxu3 %v357_v31 }
 0x1bc   :  { %v198_v35 = vpop.f32.mrf.mxu3 }
 0x1bd   :  { %v201_v36 = vadd.f32 %v198_v35, %v120_v34 }
 0x1bf   :  { %358 = vtanh.f32 %v201_v36 }
 0x1c5   :  { %v359_v37 = vpop.eup %358 }
 0x1c6   :  { %219 = vmatmul.f32.vlgmr.msrb.gmra.mxu1 %v359_v37 }
 0x243   :  { %v220_v41 = vpop.f32.mrf.mxu1 }
 0x244   :  { %v223_v42 = vadd.f32 %v220_v41, %v123_v40 }
 0x246   :  { %360 = vtanh.f32 %v223_v42 }
 0x24c   :  { %v361_v43 = vpop.eup %360 }
 0x24d   :  { %241 = vmatmul.f32.vlgmr.msrb.gmra.mxu2 %v361_v43 }
 0x2d0   :  { %v242_v48 = vpop.f32.mrf.mxu2 }
 0x2d1   :  { %v245_v49 = vadd.f32 %v242_v48, %v126_v47 }
 0x2d3   :  { %362 = vtanh.f32 %v245_v49 }
 0x2d9   :  { %v363_v50 = vpop.eup %362 }
 0x2da   :  { %263 = vmatmul.f32.vlgmr.msrb.gmra.mxu3 %v363_v50 }
 0x35d   :  { %v264_v54 = vpop.f32.mrf.mxu3 }
 0x35e   :  { %v267_v55 = vadd.f32 %v264_v54, %v129_v53 }
 0x360   :  { %364 = vtanh.f32 %v267_v55 }
 0x366   :  { %v365_v56 = vpop.eup %364 }
 0x367   :  { %285 = vmatmul.f32.vlgmr.msrb.gmra.mxu0 %v365_v56 }
 0x3e4   :  { %v286_v7 = vpop.f32.mrf.mxu0 }
 0x3e5   :  { %v289_v8 = vadd.f32 %v286_v7, %v132_v6 }
 0x3e7   :  { %366 = vtanh.f32 %v289_v8 }
 0x3ed   :  { %v367_v9 = vpop.eup %366 }
 0x3ee   :  { %307 = vmatmul.f32.vlgmr.msra.gmra.mxu1 %v367_v9 }
 0x46b   :  { %v308_v16 = vpop.f32.mrf.mxu1 }
 0x46c   :  { %v311_v17 = vadd.f32 %v308_v16, %v135_v15 }
 0x46e   :  { %368 = vtanh.f32 %v311_v17 }
 0x474   :  { %v369_v18 = vpop.eup %368 }
 0x475   :  { %330 = vmatmul.f32.vlgmr.msra.gmra.mxu2 %v369_v18 }
 0x4f8   :  { %v331_v21 = vpop.f32.mrf.mxu2 }
 0x4f9   :  { %v332_v22 = vadd.f32 %v353_v19, %v331_v21 }
 0x4fb   :  { %334 = vst [vmem:[%s625_s2] sm:$0xff] %v332_v22 }
 0x4fc   :  { %339 = vsyncpa [#allocation3], 1 }

</bundles_post_ra>
